<compile_context>
chip_gen: v7x
topology: tpu7x:2x2x1
jax: 0.10.0
libtpu: 0.0.40
codegen_flags: <defaults>
</compile_context>

<pallas_src>
import jax
import jax.numpy as jnp
from jax.experimental import pallas as pl
from jax.experimental.pallas import tpu as pltpu

_LANE = 128
_SUB = 8
_F32 = 4


def _round_up(n, m):
    return ((n + m - 1) // m) * m


def _sin_emb_kernel(x_ref, s_ref, phase_ref, o_ref):
    # x_ref: (TB, num_items); s_ref: (num_items, TD); phase_ref: (1, TD); o_ref: (TB, TD)
    # One MXU matmul builds the interleaved angle tile:
    #   ang[b, i*d_stack + k] = x[b, i] * theta_interleaved[k]   (lane k owned by item i)
    # HIGHEST precision keeps the angles at ~f32 accuracy (needed for 1e-5 tolerance).
    ang = jnp.dot(
        x_ref[...],
        s_ref[...],
        preferred_element_type=jnp.float32,
        precision=jax.lax.Precision.HIGHEST,
    )
    # Phase row turns odd lanes into sin via cos(a - pi/2) == sin(a): one transcendental
    # per lane, no select, one full-width lane-dense store.
    o_ref[...] = jnp.cos(ang + phase_ref[...]).astype(o_ref.dtype)


def _tpu_vmem_and_cores():
    """(per-core VMEM bytes, is this a 2-TensorCore part e.g. v7x)."""
    vmem_cap = 64 * 1024 * 1024  # conservative fallback = v7x per-TC size
    try:
        vmem_cap = int(pltpu.get_tpu_info().vmem_capacity_bytes)
    except Exception:
        pass
    two_cores = False
    try:
        kind = jax.devices()[0].device_kind.lower()
        two_cores = "v7" in kind  # v7x: 2 TensorCores share the "parallel" grid axes
    except Exception:
        pass
    return vmem_cap, two_cores


def _footprint_bytes(tile_b, tile_d, num_items):
    """Real per-step VMEM footprint (lane-padded x tile, double-buffered everything)."""
    x_in = 2 * tile_b * _round_up(num_items, _LANE) * _F32          # x tile, 2 buffers
    out = 2 * tile_b * tile_d * _F32                                 # out tile, 2 buffers
    params = 2 * (_round_up(num_items, _SUB) + _SUB) * tile_d * _F32  # sel + phase
    return x_in + out + params


def _choose_tiles(B, num_items, d_model, vmem_cap, two_cores):
    # Per-step footprint cap; leaves headroom for Mosaic internal scratch + pipeline state.
    budget = int(0.35 * vmem_cap)

    # --- batch tiling: multiples of 8, minimal ragged waste --------------------------
    target_tb = 512  # large tiles amortize the ~0.35us/step pipeline overhead
    n_b = pl.cdiv(B, target_tb)
    # v7x only: keep an even number of batch steps so neither TensorCore idles, but only
    # when a step is worth a few hundred KiB of output (otherwise splitting is pure overhead).
    per_step_bytes_est = min(B, target_tb) * d_model * _F32
    if two_cores and per_step_bytes_est >= (512 << 10):
        if n_b == 1:
            n_b = 2
        elif n_b % 2:
            n_b += 1
    tile_b = min(_round_up(B, _SUB), _round_up(pl.cdiv(B, n_b), _SUB))

    # --- d_model tiling under the VMEM budget -----------------------------------------
    if _footprint_bytes(tile_b, d_model, num_items) <= budget:
        tile_d = d_model
    else:
        # Keep tile_b large; bound the per-step output via a d_model grid axis.
        # Shrink tile_b only if even a single 128-lane column tile would not fit.
        while tile_b > 2 * _SUB and _footprint_bytes(tile_b, _LANE, num_items) > budget:
            tile_b = _round_up(tile_b // 2, _SUB)
        fixed = 2 * tile_b * _round_up(num_items, _LANE) * _F32
        per_col = (2 * tile_b + 2 * (_round_up(num_items, _SUB) + _SUB)) * _F32
        tile_d = ((budget - fixed) // per_col) // _LANE * _LANE if budget > fixed else _LANE
        tile_d = int(min(d_model, max(_LANE, tile_d)))
    return tile_b, tile_d


def stacked_sinusoidal_embedding(x, theta, *, tile_b=None, tile_d=None,
                                 out_dtype=jnp.float32):
    """x: (B, num_items), theta: (d_stack//2,) -> (B, num_items*d_stack)."""
    B, num_items = x.shape
    half = theta.shape[0]
    d_stack = 2 * half
    d_model = num_items * d_stack

    vmem_cap, two_cores = _tpu_vmem_and_cores()
    auto_b, auto_d = _choose_tiles(B, num_items, d_model, vmem_cap, two_cores)
    tile_b = auto_b if tile_b is None else int(tile_b)
    tile_d = auto_d if tile_d is None else int(tile_d)

    x_f32 = x.astype(jnp.float32)

    # --- parameter setup (glue, traced once) -------------------------------------------
    # S[i, i*d_stack + 2j] = S[i, i*d_stack + 2j + 1] = theta[j]; everything else 0.
    theta_i = jnp.repeat(theta.astype(jnp.float32), 2)                    # (d_stack,)
    sel = (jnp.eye(num_items, dtype=jnp.float32)[:, :, None]
           * theta_i[None, None, :]).reshape(num_items, d_model)
    # Phase row: 0 on even (cos) lanes, -pi/2 on odd (sin) lanes.
    phase = jnp.tile(jnp.array([0.0, -jnp.pi / 2.0], jnp.float32),
                     d_model // 2)[None, :]

    grid = (pl.cdiv(B, tile_b), pl.cdiv(d_model, tile_d))

    footprint = _footprint_bytes(tile_b, tile_d, num_items)
    vmem_limit = int(min(int(0.8 * vmem_cap),
                         max(16 * 1024 * 1024, footprint + (4 << 20))))

    cost = pl.CostEstimate(
        flops=2 * B * num_items * d_model,
        transcendentals=B * d_model,
        bytes_accessed=_F32 * (B * num_items + num_items * d_model + d_model)
        + B * d_model * jnp.dtype(out_dtype).itemsize,
    )

    return pl.pallas_call(
        _sin_emb_kernel,
        out_shape=jax.ShapeDtypeStruct((B, d_model), out_dtype),
        grid=grid,
        in_specs=[
            pl.BlockSpec((tile_b, num_items), lambda b, d: (b, 0)),  # resident across d
            pl.BlockSpec((num_items, tile_d), lambda b, d: (0, d)),
            pl.BlockSpec((1, tile_d), lambda b, d: (0, d)),
        ],
        out_specs=pl.BlockSpec((tile_b, tile_d), lambda b, d: (b, d)),
        compiler_params=pltpu.CompilerParams(
            dimension_semantics=("parallel", "parallel"),
            vmem_limit_bytes=vmem_limit,
        ),
        cost_estimate=cost,
    )(x_f32, sel, phase)


def reference(x, theta):
    # Pure-JAX replica of the PyTorch forward.
    ang = x[..., None] * theta                               # (B, N, half)
    out = jnp.stack((jnp.cos(ang), jnp.sin(ang)), axis=-1)   # (B, N, half, 2)
    return out.reshape(x.shape[0], -1)                       # flatten(-3)


if __name__ == "__main__":
    def make_theta(d_model, num_items, base=10000.0):
        d_stack = d_model // num_items
        h = d_stack // 2
        return 1.0 / base ** (2.0 * jnp.arange(h, dtype=jnp.float32) / d_stack)

    key = jax.random.PRNGKey(0)
    k1, k2, k3 = jax.random.split(key, 3)

    # 1) Small config matching the module defaults (d_model=128, num_items=4), B=16.
    d_model, num_items = 128, 4
    theta = make_theta(d_model, num_items)
    x1 = jax.random.normal(k1, (16, num_items), dtype=jnp.float32) * 3.0
    out1 = jax.block_until_ready(stacked_sinusoidal_embedding(x1, theta))
    ref1 = reference(x1, theta)
    assert out1.shape == (16, d_model), out1.shape
    assert jnp.allclose(out1, ref1, atol=1e-5, rtol=1e-5), float(jnp.abs(out1 - ref1).max())

    # 2) Ragged batch (B not a multiple of tile_b): exercises the masked last block
    #    instead of the old pad + out[:B] slice.
    x2 = jax.random.normal(k2, (136, num_items), dtype=jnp.float32) * 3.0
    out2 = jax.block_until_ready(stacked_sinusoidal_embedding(x2, theta, tile_b=64))
    ref2 = reference(x2, theta)
    assert out2.shape == (136, d_model), out2.shape
    assert jnp.allclose(out2, ref2, atol=1e-5, rtol=1e-5), float(jnp.abs(out2 - ref2).max())

    # 3) d_model-tiled path (2-D grid) with a ragged batch axis.
    d_model3, num_items3 = 512, 4
    theta3 = make_theta(d_model3, num_items3)
    x3 = jax.random.normal(k3, (24, num_items3), dtype=jnp.float32) * 3.0
    out3 = jax.block_until_ready(
        stacked_sinusoidal_embedding(x3, theta3, tile_b=16, tile_d=256))
    ref3 = reference(x3, theta3)
    assert out3.shape == (24, d_model3), out3.shape
    assert jnp.allclose(out3, ref3, atol=1e-5, rtol=1e-5), float(jnp.abs(out3 - ref3).max())

    print("KERNEL_OK")
</pallas_src>

<mosaic_0001>
module attributes {stable_mosaic.version = 11 : i64} {
  func.func @_sin_emb_kernel(%arg0: i32, %arg1: i32, %arg2: memref<16x4xf32, #tpu.memory_space<vmem>>, %arg3: memref<4x128xf32, #tpu.memory_space<vmem>>, %arg4: memref<1x128xf32, #tpu.memory_space<vmem>>, %arg5: memref<16x128xf32, #tpu.memory_space<vmem>>) attributes {dimension_semantics = [#tpu.dimension_semantics<parallel>, #tpu.dimension_semantics<parallel>], iteration_bounds = array<i64: 1, 1>, scalar_prefetch = 0 : i64, scratch_operands = 0 : i64, tpu.core_type = #tpu.core_type<tc>, window_params = [{transform_indices = @transform_0, window_bounds = array<i64: 16, 4>}, {transform_indices = @transform_1, window_bounds = array<i64: 4, 128>}, {transform_indices = @transform_2, window_bounds = array<i64: 1, 128>}, {transform_indices = @transform_3, window_bounds = array<i64: 16, 128>}]} {
    %c0 = arith.constant 0 : index
    %c0_0 = arith.constant 0 : index
    %0 = vector.load %arg2[%c0, %c0_0] : memref<16x4xf32, #tpu.memory_space<vmem>>, vector<16x4xf32>
    %c0_1 = arith.constant 0 : index
    %c0_2 = arith.constant 0 : index
    %1 = vector.load %arg3[%c0_1, %c0_2] : memref<4x128xf32, #tpu.memory_space<vmem>>, vector<4x128xf32>
    %cst = arith.constant dense<0.000000e+00> : vector<16x128xf32>
    %2 = tpu.matmul %0, %1, %cst {dimension_numbers = #tpu.dot_dimension_numbers<[1], [0], [0], [1], [0, 0, 1, 1], [], []>, precision = #tpu.contract_precision<fp32>} : vector<16x4xf32>, vector<4x128xf32>, vector<16x128xf32> -> vector<16x128xf32>
    %c0_3 = arith.constant 0 : index
    %c0_4 = arith.constant 0 : index
    %3 = vector.load %arg4[%c0_3, %c0_4] : memref<1x128xf32, #tpu.memory_space<vmem>>, vector<1x128xf32>
    %4 = vector.broadcast %3 : vector<1x128xf32> to vector<16x128xf32>
    %5 = arith.addf %2, %4 : vector<16x128xf32>
    %6 = math.cos %5 : vector<16x128xf32>
    %c0_5 = arith.constant 0 : index
    %c0_6 = arith.constant 0 : index
    %7 = vector.load %arg5[%c0_5, %c0_6] : memref<16x128xf32, #tpu.memory_space<vmem>>, vector<16x128xf32>
    tpu.vector_store %arg5[%c0_5, %c0_6], %6 {strides = array<i32>} : memref<16x128xf32, #tpu.memory_space<vmem>>, vector<16x128xf32>,
    return
  }
  func.func @transform_0(%arg0: i32, %arg1: i32) -> (i32, i32) {
    %c0_i32 = arith.constant 0 : i32
    %c0_i32_0 = arith.constant 0 : i32
    return %arg0, %c0_i32 : i32, i32
  }
  func.func @transform_1(%arg0: i32, %arg1: i32) -> (i32, i32) {
    %c0_i32 = arith.constant 0 : i32
    %c0_i32_0 = arith.constant 0 : i32
    return %c0_i32, %arg1 : i32, i32
  }
  func.func @transform_2(%arg0: i32, %arg1: i32) -> (i32, i32) {
    %c0_i32 = arith.constant 0 : i32
    %c0_i32_0 = arith.constant 0 : i32
    return %c0_i32, %arg1 : i32, i32
  }
  func.func @transform_3(%arg0: i32, %arg1: i32) -> (i32, i32) {
    %c0_i32 = arith.constant 0 : i32
    return %arg0, %arg1 : i32, i32
  }
}

</mosaic_0001>

<bundles_post_ra>
// kernel: tpu_custom_call.1
= control target key start
LH: loop header
LB: loop body
LE: loop exit
PB: predicated region body
PF: predicated region fallthrough
CT: control target
= control target key end

     0   :  { %vm32_vm0 = vcmask 1043456   ;;  %vm25_vm1 = vcmask 31744   ;;  %s998_s0 = inlined_call_operand.vmem [shape: f32[16,4], index: 0, kind: input, shape index: {}]   ;;  %s999_s1 = inlined_call_operand.vmem [shape: f32[4,128], index: 1, kind: input, shape index: {}]   ;;  %s1000_s2 = inlined_call_operand.vmem [shape: f32[1,128], index: 2, kind: input, shape index: {}]   ;;  %s1001_s3 = inlined_call_operand.hbm [shape: f32[16,128], index: 3, kind: output, shape index: {}]  }
   0x1   :  { %v17_v0 = vld [vmem:[%s999_s1] sm:$0xf]  ;;  %v16_v2 = vld [vmem:[%s998_s0 + $0x8] sm:$0xff] }
   0x2   :  { %v15_v1 = vld [vmem:[%s998_s0] sm:$0xff]  ;;  %v34_v3 = vsel %vm32_vm0, %v17_v0, 0  ;;  %v30_v5 = vsel %vm25_vm1, %v16_v2, 0 }
   0x3   :  { %v27_v4 = vsel %vm25_vm1, %v15_v1, 0 }
   0x4   :  { %8 = vsyncpa [#allocation3], 0  ;;  %v37_v6 = vand.u32 4294901760, %v34_v3  ;;  %v102_v7 = vand.u32 4294901760, %v27_v4  ;;  %v112_v8 = vand.u32 4294901760, %v30_v5 }
   0x5   :  { %v749_v23 = vld [vmem:[%s1000_s2] ss:$0 sm:$0xff]  ;;  %v867_v50 = vmov 683565275   ;;  %v868_v54 = vmov 2475754826  }
   0x6   :  { %791 = vmatprep.subr.mxu0 %v37_v6  ;;  %v103_v9 = vsub.f32 %v27_v4, %v102_v7  ;;  %v113_v10 = vsub.f32 %v30_v5, %v112_v8  ;;  %776 = vmatprep.subr.mxu1 %v37_v6  ;;  %v124_v11 = vsub.f32 %v34_v3, %v37_v6  ;;  %v869_v56 = vmov 2131351028   ;;  %s873_s2 = smov [#allocation2]  }
   0x7   :  { %792 = vmatpush3.msra.mxu0 %v37_v6  ;;  %777 = vmatpush3.msra.mxu1 %v37_v6  ;;  %v870_v58 = vmov 2102212464   ;;  %v871_v60 = vmov 920167782   ;;  %v872_v3 = vmov 1326507024  }
   0x8   :  { %v104_v12 = vand.u32 4294901760, %v103_v9  ;;  %v114_v13 = vand.u32 4294901760, %v113_v10  ;;  %v125_v14 = vand.u32 4294901760, %v124_v11  ;;  %s738_s18 = sshll.u32 %s873_s2, 4  ;;  %s739_s18 = int_to_ptr.vmem [resolvable:$true] %s738_s18 }
   0x9   :  { %s843_s19 = scalar_lea.vmem %s739_s18, 256  ;;  %p848_p1 = scmp.lt.s32.totalorder %s739_s18, %s739_s18 }
   0xa   :  { %793 = vmatprep.mubr.f32.mxu0 %v104_v12  ;;  %v105_v15 = vsub.f32 %v103_v9, %v104_v12  ;;  %v126_v16 = vsub.f32 %v124_v11, %v125_v14  ;;  %v115_v17 = vsub.f32 %v113_v10, %v114_v13  ;;  %796 = vmatprep.subr.mxu0 %v125_v14  ;;  %p844_p0 = scmp.ne.s32.totalorder %s739_s18, %s843_s19  ;;  %p849_p2 = scmp.lt.s32.totalorder %s843_s19, %s843_s19 }
   0xb   :  { %794 = vmatmul.mubr.f32.vlgmr.msra.gmra.mrb[0].mxu0 %v114_v13 }
   0xc   :  { %v106_v18 = vand.u32 4294901760, %v105_v15  ;;  %v127_v19 = vand.u32 4294901760, %v126_v16  ;;  %v116_v20 = vand.u32 4294901760, %v115_v17  ;;  %797 = vmatpush3.msra.mxu0 %v125_v14  ;;  %798 = vmatprep.mubr.f32.mxu0 %v102_v7  ;;  %p850_p3 = por %p849_p2, %p848_p1 }
   0xd   :  { %801 = vmatprep.subr.mxu0 %v37_v6 }
   0xe   :  { %778 = vmatprep.mubr.f32.mxu1 %v106_v18  ;;  %781 = vmatprep.subr.mxu1 %v127_v19  ;;  %p851_p4 = pnand %p850_p3, %p844_p0 }
   0xf   :  { %779 = vmatmul.mubr.f32.vlgmr.msra.gmra.mrb[0].mxu1 %v116_v20 }
  0x10   :  { %782 = vmatpush3.msra.mxu1 %v127_v19  ;;  %783 = vmatprep.mubr.f32.mxu1 %v102_v7 }
  0x11   :  { %786 = vmatprep.subr.mxu1 %v124_v11 }
  0x13   :  { %799 = vmatmul.mubr.f32.vlgmr.msra.gmra.mrb[0].mxu0 %v112_v8 }
  0x14   :  { %802 = vmatpush3.msra.mxu0 %v37_v6  ;;  %803 = vmatprep.mubr.f32.mxu0 %v102_v7 }
  0x17   :  { %784 = vmatmul.mubr.f32.vlgmr.msra.gmra.mrb[0].mxu1 %v112_v8 }
  0x18   :  { %787 = vmatpush3.msra.mxu1 %v124_v11  ;;  %788 = vmatprep.mubr.f32.mxu1 %v103_v9 }
  0x1b   :  { %804 = vmatmul.mubr.f32.vlgmr.msra.gmra.mrb[0].mxu0 %v112_v8 }
  0x1f   :  { %789 = vmatmul.mubr.f32.vlgmr.msra.gmra.mrb[0].mxu1 %v113_v10 }
  0xee   :  { %v805_v21 = vpop.f32.mrb[0].mxu0 }
  0xef   :  { %v515_v22 = vpop.f32.mrb[1].mxu0 }
  0xf2   :  { %v790_v24 = vpop.f32.mrb[0].mxu1 }
  0xf3   :  { %v806_v25 = vadd.f32 %v790_v24, %v749_v23  ;;  %v274_v26 = vpop.f32.mrb[1].mxu1 }
  0xf4   :  { %v808_v27 = vadd.f32 %v749_v23, %v274_v26 }
  0xf5   :  { %v908_v28 = vadd.f32 %v806_v25, %v805_v21 }
  0xf6   :  { %v910_v29 = vadd.f32 %v808_v27, %v515_v22 }
  0xf7   :  { %v628_v30 = vand.u32 2147483647, %v908_v28  ;;  %v631_v31 = vand.u32 2139095040, %v908_v28  ;;  %vm630_vm0 = vcmp.lt.s32.totalorder %v908_v28, 0 }
  0xf8   :  { %v528_v32 = vand.u32 2139095040, %v910_v29  ;;  %v525_v35 = vand.u32 2147483647, %v910_v29 }
  0xf9   :  { %v632_v33 = vshrl.u32 %v631_v31, 23  ;;  %v635_v34 = vand.u32 8388607, %v628_v30  ;;  %vm963_vm1 = vcmp.le.f32.partialorder %v628_v30, 0.7853982 }
  0xfa   :  { %v529_v36 = vshrl.u32 %v528_v32, 23  ;;  %v920_v41 = vand.u32 8388607, %v525_v35 }
  0xfb   :  { %v754_v37 = vadd.s32 4294967169, %v632_v33  ;;  %v636_v40 = vor.u32 8388608, %v635_v34 }
  0xfc   :  { %v750_v38 = vadd.s32 4294967169, %v529_v36  ;;  %v533_v48 = vor.u32 8388608, %v920_v41 }
  0xfd   :  { %v638_v39 = vadd.s32 1, %v754_v37  ;;  %v922_v47 = vshll.u32 %v636_v40, 8 }
  0xfe   :  { %v535_v42 = vadd.s32 1, %v750_v38 }
  0xff   :  { %vm639_vm2 = vcmp.gt.s32.totalorder %v638_v39, 0 }
 0x100   :  { %v640_v43 = vsel %vm639_vm2, %v638_v39, 0  ;;  %vm536_vm3 = vcmp.gt.s32.totalorder %v535_v42, 0  ;;  %vm527_vm2 = vcmp.lt.s32.totalorder %v910_v29, 0 }
 0x101   :  { %v641_v44 = vshrl.u32 %v640_v43, 5  ;;  %v642_v45 = vand.u32 31, %v640_v43  ;;  %v537_v46 = vsel %vm536_vm3, %v535_v42, 0  ;;  %v573_v42 = vshll.u32 %v533_v48, 8 }
 0x102   :  { %v925_v52 = vshrl.u32 %v537_v46, 5  ;;  %v539_v53 = vand.u32 31, %v537_v46  ;;  %vm975_vm3 = vcmp.le.f32.partialorder %v525_v35, 0.7853982 }
 0x103   :  { %v643_v49 = vsub.s32 32, %v642_v45  ;;  %v645_v51 = vshll.u32 %v867_v50, %v642_v45  ;;  %v648_v55 = vshll.u32 %v868_v54, %v642_v45  ;;  %v651_v57 = vshll.u32 %v869_v56, %v642_v45 }
 0x104   :  { %v654_v59 = vshll.u32 %v870_v58, %v642_v45  ;;  %v657_v61 = vshll.u32 %v871_v60, %v642_v45  ;;  %vm660_vm4 = vcmp.lt.s32.totalorder %v641_v44, 1  ;;  %vm661_vm5 = vcmp.lt.s32.totalorder %v641_v44, 2 }
 0x105   :  { %v646_v62 = vshrl.u32 %v868_v54, %v643_v49  ;;  %v649_v63 = vshrl.u32 %v869_v56, %v643_v49  ;;  %v652_v0 = vshrl.u32 %v870_v58, %v643_v49  ;;  %v644_v1 = vshrl.u32 %v867_v50, %v643_v49 }
 0x106   :  { %v655_v2 = vshrl.u32 %v871_v60, %v643_v49  ;;  %v658_v4 = vshrl.u32 %v872_v3, %v643_v49  ;;  %v540_v8 = vsub.s32 32, %v539_v53  ;;  %vm662_vm6 = vcmp.lt.s32.totalorder %v641_v44, 3 }
 0x107   :  { %v647_v5 = vor.u32 %v646_v62, %v645_v51  ;;  %v650_v6 = vor.u32 %v649_v63, %v648_v55  ;;  %v653_v7 = vor.u32 %v652_v0, %v651_v57  ;;  %vm663_vm7 = vcmp.lt.s32.totalorder %v641_v44, 4 }
 0x108   :  { %v656_v9 = vor.u32 %v655_v2, %v654_v59  ;;  %v659_v10 = vor.u32 %v658_v4, %v657_v61  ;;  %v542_v18 = vshll.u32 %v867_v50, %v539_v53  ;;  %v543_v21 = vshrl.u32 %v868_v54, %v540_v8 }
 0x109   :  { %v664_v11 = vsel %vm660_vm4, %v644_v1, %v647_v5  ;;  %v665_v12 = vsel %vm663_vm7, %v653_v7, 2102212464  ;;  %v668_v13 = vsel %vm660_vm4, %v647_v5, %v650_v6  ;;  %v672_v14 = vsel %vm660_vm4, %v650_v6, %v653_v7 }
 0x10a   :  { %v666_v15 = vsel %vm662_vm6, %v650_v6, %v665_v12  ;;  %v669_v16 = vsel %vm663_vm7, %v656_v9, 920167782  ;;  %v673_v17 = vsel %vm663_vm7, %v659_v10, 1326507024  ;;  %v545_v22 = vshll.u32 %v868_v54, %v539_v53 }
 0x10b   :  { %v670_v19 = vsel %vm662_vm6, %v653_v7, %v669_v16  ;;  %v674_v20 = vsel %vm662_vm6, %v656_v9, %v673_v17  ;;  %v667_v23 = vsel %vm661_vm5, %v664_v11, %v666_v15  ;;  %v546_v26 = vshrl.u32 %v869_v56, %v540_v8 }
 0x10c   :  { %v671_v24 = vsel %vm661_vm5, %v668_v13, %v670_v19  ;;  %v675_v25 = vsel %vm661_vm5, %v672_v14, %v674_v20  ;;  %v544_v34 = vor.u32 %v543_v21, %v542_v18  ;;  %v548_v37 = vshll.u32 %v869_v56, %v539_v53 }
 0x10d   :  { %v934_v27 = vmul.u32.u64.low %v922_v47, %v675_v25  ;;  %v935_v31 = vmul.u32.u64.high %v922_v47, %v675_v25, %v934_v27  ;;  %v938_v32 = vmul.u32.u64.low %v922_v47, %v671_v24  ;;  %v939_v33 = vmul.u32.u64.high %v922_v47, %v671_v24, %v938_v32 }
 0x10e   :  { %v547_v36 = vor.u32 %v546_v26, %v545_v22  ;;  %v549_v38 = vshrl.u32 %v870_v58, %v540_v8  ;;  %v551_v39 = vshll.u32 %v870_v58, %v539_v53  ;;  %v552_v40 = vshrl.u32 %v871_v60, %v540_v8 }
 0x10f   :  { %v555_v41 = vshrl.u32 %v872_v3, %v540_v8  ;;  %v683_v43 = vmul.u32 %v922_v47, %v667_v23  ;;  %v541_v44 = vshrl.u32 %v867_v50, %v540_v8  ;;  %v554_v46 = vshll.u32 %v871_v60, %v539_v53 }
 0x110   :  { %v550_v45 = vor.u32 %v549_v38, %v548_v37  ;;  %vm685_vm8 = vc.u32 %v935_v31, %v938_v32  ;;  %v686_v49 = vadd.s32 1, %v939_v33  ;;  %v553_v51 = vor.u32 %v552_v40, %v551_v39 }
 0x111   :  { %vm557_vm9 = vcmp.lt.s32.totalorder %v925_v52, 1  ;;  %v556_v54 = vor.u32 %v555_v41, %v554_v46  ;;  %vm559_vm10 = vcmp.lt.s32.totalorder %v925_v52, 3  ;;  %vm560_vm11 = vcmp.lt.s32.totalorder %v925_v52, 4 }
 0x112   :  { %v565_v55 = vsel %vm557_vm9, %v544_v34, %v547_v36  ;;  %v687_v48 = vsel %vm685_vm8, %v686_v49, %v939_v33  ;;  %v562_v56 = vsel %vm560_vm11, %v550_v45, 2102212464  ;;  %v566_v47 = vsel %vm560_vm11, %v553_v51, 920167782 }
 0x113   :  { %v569_v50 = vsel %vm557_vm9, %v547_v36, %v550_v45  ;;  %v688_v57 = vadd.s32 %v687_v48, %v683_v43  ;;  %vm558_vm12 = vcmp.lt.s32.totalorder %v925_v52, 2  ;;  %v567_v53 = vsel %vm559_vm10, %v550_v45, %v566_v47 }
 0x114   :  { %v570_v58 = vsel %vm560_vm11, %v556_v54, 1326507024  ;;  %v561_v59 = vsel %vm557_vm9, %v541_v44, %v544_v34  ;;  %v563_v60 = vsel %vm559_vm10, %v547_v36, %v562_v56  ;;  %v568_v61 = vsel %vm558_vm12, %v565_v55, %v567_v53 }
 0x115   :  { %v571_v62 = vsel %vm559_vm10, %v553_v51, %v570_v58  ;;  %v689_v63 = vadd.s32 536870912, %v688_v57  ;;  %v949_v1 = vmul.u32.u64.low %v573_v42, %v568_v61  ;;  %v950_v2 = vmul.u32.u64.high %v573_v42, %v568_v61, %v949_v1 }
 0x116   :  { %v572_v0 = vsel %vm558_vm12, %v569_v50, %v571_v62  ;;  %v564_v6 = vsel %vm558_vm12, %v561_v59, %v563_v60  ;;  %v684_v22 = vadd.s32 %v938_v32, %v935_v31  ;;  %vm720_vm7 = vweird.f32 %v908_v28 }
 0x117   :  { %v952_v3 = vmul.u32.u64.low %v573_v42, %v572_v0  ;;  %v953_v4 = vmul.u32.u64.high %v573_v42, %v572_v0, %v952_v3  ;;  %v690_v5 = vshrl.u32 %v689_v63, 30  ;;  %v583_v8 = vadd.s32 1, %v950_v2 }
 0x118   :  { %v580_v52 = vmul.u32 %v573_v42, %v564_v6  ;;  %vm617_vm11 = vweird.f32 %v910_v29 }
 0x119   :  { %v691_v7 = vshll.u32 %v690_v5, 30  ;;  %vm582_vm13 = vc.u32 %v953_v4, %v949_v1  ;;  %v581_v43 = vadd.s32 %v949_v1, %v953_v4  ;;  %v714_v47 = vsub.s32 4, %v690_v5 }
 0x11a   :  { %v584_v10 = vsel %vm582_vm13, %v583_v8, %v950_v2 }
 0x11b   :  { %v692_v9 = vsub.s32 %v688_v57, %v691_v7  ;;  %v585_v11 = vadd.s32 %v584_v10, %v580_v52  ;;  %v715_v59 = vsel %vm630_vm0, %v714_v47, %v690_v5 }
 0x11c   :  { %v717_v30 = vsel %vm963_vm1, 0, %v715_v59 }
 0x11d   :  { %v694_v12 = vsub.s32 0, %v692_v9  ;;  %v586_v13 = vadd.s32 536870912, %v585_v11  ;;  %v721_v2 = vand.u32 3, %v717_v30 }
 0x11f   :  { %v755_v14 = vmin.u32 %v694_v12, %v692_v9  ;;  %v587_v15 = vshrl.u32 %v586_v13, 30  ;;  %vm726_vm4 = vcmp.eq.s32.totalorder %v721_v2, 2  ;;  %vm723_vm5 = vcmp.eq.s32.totalorder %v721_v2, 0 }
 0x120   :  { %vm722_vm6 = vcmp.lt.s32.totalorder %v721_v2, 2 }
 0x121   :  { %v696_v16 = vclz %v755_v14  ;;  %v588_v17 = vshll.u32 %v587_v15, 30  ;;  %v611_v0 = vsub.s32 4, %v587_v15 }
 0x123   :  { %v756_v18 = vadd.s32 4294967294, %v696_v16  ;;  %v589_v19 = vsub.s32 %v585_v11, %v588_v17  ;;  %v612_v5 = vsel %vm527_vm2, %v611_v0, %v587_v15 }
 0x124   :  { %v614_v8 = vsel %vm975_vm3, 0, %v612_v5 }
 0x125   :  { %vm757_vm14 = vcmp.lt.s32.totalorder %v756_v18, 0  ;;  %v591_v21 = vsub.s32 0, %v589_v19  ;;  %v618_v11 = vand.u32 3, %v614_v8 }
 0x126   :  { %v699_v20 = vsel %vm757_vm14, 0, %v756_v18 }
 0x127   :  { %v700_v23 = vsub.s32 32, %v699_v20  ;;  %v704_v24 = vsub.s32 4294967266, %v699_v20  ;;  %v751_v25 = vmin.u32 %v591_v21, %v589_v19  ;;  %v701_v26 = vshll.u32 %v692_v9, %v699_v20 }
 0x128   :  { %vm623_vm8 = vcmp.eq.s32.totalorder %v618_v11, 2  ;;  %vm620_vm9 = vcmp.eq.s32.totalorder %v618_v11, 0  ;;  %vm619_vm10 = vcmp.lt.s32.totalorder %v618_v11, 2 }
 0x129   :  { %v702_v27 = vshrl.u32 %v684_v22, %v700_v23  ;;  %v705_v33 = vadd.s32 127, %v704_v24  ;;  %v593_v34 = vclz %v751_v25 }
 0x12b   :  { %v703_v36 = vor.u32 %v702_v27, %v701_v26  ;;  %v706_v37 = vshll.u32 %v705_v33, 23  ;;  %v752_v38 = vadd.s32 4294967294, %v593_v34 }
 0x12d   :  { %v707_v39 = vor.u32 4788187, %v706_v37  ;;  %vm753_vm15 = vcmp.lt.s32.totalorder %v752_v38, 0  ;;  %v710_v41 = vcvt.s32.f32 %v703_v36 }
 0x12e   :  { %v596_v42 = vsel %vm753_vm15, 0, %v752_v38 }
 0x12f   :  { %v708_v40 = vand.u32 2147483647, %v707_v39  ;;  %v597_v44 = vsub.s32 32, %v596_v42  ;;  %v601_v45 = vsub.s32 4294967266, %v596_v42  ;;  %v598_v32 = vshll.u32 %v589_v19, %v596_v42 }
 0x131   :  { %v711_v31 = vmul.f32 %v710_v41, %v708_v40  ;;  %v599_v46 = vshrl.u32 %v581_v43, %v597_v44  ;;  %v602_v49 = vadd.s32 127, %v601_v45 }
 0x133   :  { %v712_v51 = vxor.u32 2147483648, %v711_v31  ;;  %v600_v54 = vor.u32 %v599_v46, %v598_v32  ;;  %v603_v55 = vshll.u32 %v602_v49, 23 }
 0x135   :  { %v713_v56 = vsel %vm630_vm0, %v712_v51, %v711_v31  ;;  %v604_v57 = vor.u32 4788187, %v603_v55  ;;  %v607_v58 = vcvt.s32.f32 %v600_v54 }
 0x136   :  { %v716_v50 = vsel %vm963_vm1, %v908_v28, %v713_v56 }
 0x137   :  { %835 = vcosq.f32 %v716_v50  ;;  %v605_v53 = vand.u32 2147483647, %v604_v57 }
 0x138   :  { %837 = vsinq.f32 %v716_v50 }
 0x139   :  { %v608_v60 = vmul.f32 %v607_v58, %v605_v53 }
 0x13b   :  { %v609_v61 = vxor.u32 2147483648, %v608_v60 }
 0x13d   :  { %v610_v63 = vsel %vm527_vm2, %v609_v61, %v608_v60 }
 0x13e   :  { %v613_v1 = vsel %vm975_vm3, %v910_v29, %v610_v63 }
 0x13f   :  { %839 = vcosq.f32 %v613_v1 }
 0x140   :  { %841 = vsinq.f32 %v613_v1 }
 0x141   :  { %v836_v3 = vpop.eup %835 }
 0x142   :  { %v838_v4 = vpop.eup %837  ;;  %v727_v6 = vxor.u32 2147483648, %v836_v3 }
 0x143   :  { %v724_v7 = vxor.u32 2147483648, %v838_v4 }
 0x144   :  { %v728_v35 = vsel %vm726_vm4, %v727_v6, %v838_v4 }
 0x145   :  { %v725_v52 = vsel %vm723_vm5, %v836_v3, %v724_v7 }
 0x146   :  { %v729_v9 = vsel %vm722_vm6, %v725_v52, %v728_v35 }
 0x147   :  { %v730_v10 = vsel %vm720_vm7, nan, %v729_v9 }
 0x148   :  { %732 = vst [vmem:[#allocation2 + $0x8] sm:$0xff] %v730_v10 }
 0x149   :  { %v840_v12 = vpop.eup %839 }
 0x14a   :  { %v842_v13 = vpop.eup %841  ;;  %v624_v14 = vxor.u32 2147483648, %v840_v12 }
 0x14b   :  { %v621_v15 = vxor.u32 2147483648, %v842_v13 }
 0x14c   :  { %v625_v16 = vsel %vm623_vm8, %v624_v14, %v842_v13 }
 0x14d   :  { %v622_v17 = vsel %vm620_vm9, %v840_v12, %v621_v15 }
 0x14e   :  { %v626_v18 = vsel %vm619_vm10, %v622_v17, %v625_v16 }
 0x14f   :  { %v627_v28 = vsel %vm617_vm11, nan, %v626_v18 }
 0x150   :  { %731 = vst [vmem:[#allocation2] sm:$0xff] %v627_v28 }
 0x151   :  { %854 = shalt.err (!%p851_p4)
}
 0x152   :  { %s855_s22 = scalar_lea.hbm %s1001_s3, 256 }
 0x153   :  { %p856_p5 = scmp.ne.s32.totalorder %s1001_s3, %s855_s22  ;;  %p859_p6 = scmp.lt.u32.totalorder %s855_s22, %s1001_s3 }
 0x155   :  { %p861_p7 = pnand %p859_p6, %p856_p5 }
 0x157   :  { %864 = shalt.err (!%p861_p7)
}
 0x158   :  { %s874_s27 = smov 128   ;;  %s875_s28 = smov 8  }
 0x159   :  { %744 = dma.vmem_to_hbm [thread:$0]  %s739_s18, 256, %s1001_s3, [#allocation3], %s874_s27, %s874_s27, %s875_s28  }
 0x15a   :  { %865 = dma.done.wait [#allocation3], 256  }
 0x15b   :  { %866 = vsyncadd [#allocation3], 4294967040 }
 0x15c   :  { %748 = vsyncpa [#allocation3], 1 }

</bundles_post_ra>
